<compile_context>
chip_gen: v6e
topology: v6e:2x2x1
jax: 0.10.0
libtpu: 0.0.40
codegen_flags: <defaults>
</compile_context>

<pallas_src>
import functools

import jax
import jax.numpy as jnp
from jax import lax
from jax.experimental import pallas as pl
from jax.experimental.pallas import tpu as pltpu


def _fused_kernel(x_ref, c_ref, o_ref, *, scale):
    """One (batch-tile, K-tile) grid step.

    x_ref: (Bt, Kt) f32  — activation tile
    c_ref: (1,  Kt) f32  — hidden-reduced weight vector (column sum of W)
    o_ref: (1,  Bt) f32  — lane-dense output tile, resident across the K grid axis
    """
    k = pl.program_id(1)

    # (1, Kt) @ (Bt, Kt)^T -> (1, Bt).  A @ B^T form: the big x tile is the
    # natively-transposed MXU operand (same pattern as q @ k.T in flash attention),
    # so no XLU transpose of the x tile is materialized.
    part = lax.dot_general(
        c_ref[...], x_ref[...],
        dimension_numbers=(((1,), (1,)), ((), ())),
        preferred_element_type=jnp.float32,
    )

    @pl.when(k == 0)
    def _init():
        o_ref[...] = part

    @pl.when(k > 0)
    def _acc():
        o_ref[...] += part

    @pl.when(k == pl.num_programs(1) - 1)
    def _finish():
        # /2 and scaling_factor folded into one scalar on the tiny (1, Bt) result.
        o_ref[...] *= scale


def _tile_and_pad(dim, target):
    """Pick (tile, padded_dim) for one axis.

    - dim <= target            : single full-extent block (always legal).
    - 128-aligned with a large divisor tile: use it, no padding, no extra traffic.
    - otherwise                : pad to a multiple of 512 and tile at 512 so tiling
                                 (bounded VMEM + pipelining) is never disabled.
    """
    if dim <= target:
        return dim, dim
    if dim % 128 == 0:
        best, t = 128, 128
        while t <= target:
            if dim % t == 0:
                best = t
            t += 128
        if best >= 512:
            return best, dim
    tile = min(512, target)
    padded = -(-dim // tile) * tile
    return tile, padded


# Tile targets: x tile <= 1024 * 2048 f32 = 8 MiB per buffer, 16 MiB double-buffered —
# fits every generation (v5e/v6e 128 MiB, v7x 64 MiB physical) under a 32 MiB scoped
# VMEM limit while keeping per-step DMA time >> the ~0.35 us fixed step overhead.
_B_TARGET = 1024
_K_TARGET = 2048
_VMEM_LIMIT = 32 * 1024 * 1024


def fused_operations(x, weight, scaling_factor):
    """x: (B, I) f32, weight: (H, I) f32 -> (B, 1) f32.

    out[b, 0] = scaling_factor * sum_h((x[b, :] @ weight[h, :]) / 2)
    """
    batch, in_dim = x.shape
    hidden, in_dim_w = weight.shape
    assert in_dim == in_dim_w

    # Hoisted hidden-axis reduction: W read from HBM exactly once, as a plain XLA
    # reduce; the kernel only ever sees the (1, I) reduced vector.
    w_colsum = jnp.sum(weight.astype(jnp.float32), axis=0, keepdims=True)  # (1, I)

    b_tile, b_pad = _tile_and_pad(batch, _B_TARGET)
    k_tile, k_pad = _tile_and_pad(in_dim, _K_TARGET)

    # Zero-pad to tile multiples when needed (zeros contribute nothing to the sum;
    # padded batch rows are sliced off below).
    if b_pad != batch or k_pad != in_dim:
        x = jnp.pad(x, ((0, b_pad - batch), (0, k_pad - in_dim)))
    if k_pad != in_dim:
        w_colsum = jnp.pad(w_colsum, ((0, 0), (0, k_pad - in_dim)))

    grid = (b_pad // b_tile, k_pad // k_tile)
    scale = 0.5 * float(scaling_factor)
    kernel = functools.partial(_fused_kernel, scale=scale)

    out = pl.pallas_call(
        kernel,
        out_shape=jax.ShapeDtypeStruct((1, b_pad), jnp.float32),
        grid_spec=pltpu.PrefetchScalarGridSpec(
            num_scalar_prefetch=0,
            grid=grid,
            in_specs=[
                pl.BlockSpec((b_tile, k_tile), lambda bi, ki: (bi, ki)),
                pl.BlockSpec((1, k_tile), lambda bi, ki: (0, ki)),
            ],
            out_specs=pl.BlockSpec((1, b_tile), lambda bi, ki: (0, bi)),
        ),
        compiler_params=pltpu.CompilerParams(
            dimension_semantics=("parallel", "arbitrary"),
            vmem_limit_bytes=_VMEM_LIMIT,
        ),
        cost_estimate=pl.CostEstimate(
            flops=2 * b_pad * k_pad,
            transcendentals=0,
            bytes_accessed=(b_pad * k_pad + k_pad + b_pad) * 4,
        ),
    )(x, w_colsum)

    # Lane-dense (1, B_pad) -> module's (B, 1).
    return out[0, :batch].reshape(batch, 1)


class ModelNew:
    """JAX/Pallas port of the PyTorch ModelNew (fused matmul / 2 / sum / scale)."""

    def __init__(self, input_size, hidden_size, scaling_factor, key):
        # Deterministic init mirroring torch.randn(hidden_size, input_size).
        self.weight = jax.random.normal(key, (hidden_size, input_size), dtype=jnp.float32)
        self.scaling_factor = float(scaling_factor)

    def __call__(self, x):
        return fused_operations(x, self.weight, self.scaling_factor)


def _reference(x, w, sf):
    return jnp.sum((x @ w.T) / 2.0, axis=-1, keepdims=True) * sf


if __name__ == "__main__":
    key = jax.random.PRNGKey(0)
    k_w, k_x, k_w2, k_x2, k_w3, k_x3 = jax.random.split(key, 6)

    # 1) Small case (matches the PyTorch spec shapes): single-block path.
    batch_size, input_size, hidden_size, scaling_factor = 2, 32, 16, 1.5
    model = ModelNew(input_size, hidden_size, scaling_factor, k_w)
    x = jax.random.normal(k_x, (batch_size, input_size), dtype=jnp.float32)
    out = jax.block_until_ready(model(x))
    ref = _reference(x, model.weight, scaling_factor)
    assert out.shape == (batch_size, 1)
    assert jnp.allclose(out, ref, atol=1e-4, rtol=1e-4)

    # 2) K-tiled path (in_dim > K target, 128-aligned): exercises the resident
    #    output-block accumulation across the K grid axis.
    b2, i2, h2, sf2 = 384, 4096, 64, 0.75
    w2 = jax.random.normal(k_w2, (h2, i2), dtype=jnp.float32)
    x2 = jax.random.normal(k_x2, (b2, i2), dtype=jnp.float32)
    out2 = jax.block_until_ready(fused_operations(x2, w2, sf2))
    ref2 = _reference(x2, w2, sf2)
    assert out2.shape == (b2, 1)
    assert jnp.allclose(out2, ref2, atol=1e-2, rtol=1e-3)

    # 3) Padded path (large, non-128-aligned batch and in_dim): exercises the
    #    zero-pad + tile + slice-off fallback on both axes.
    b3, i3, h3, sf3 = 1300, 2100, 32, 2.0
    w3 = jax.random.normal(k_w3, (h3, i3), dtype=jnp.float32)
    x3 = jax.random.normal(k_x3, (b3, i3), dtype=jnp.float32)
    out3 = jax.block_until_ready(fused_operations(x3, w3, sf3))
    ref3 = _reference(x3, w3, sf3)
    assert out3.shape == (b3, 1)
    assert jnp.allclose(out3, ref3, atol=1e-2, rtol=1e-3)

    print("KERNEL_OK")
</pallas_src>

<mosaic_0001>
module attributes {stable_mosaic.version = 11 : i64} {
  func.func @_fused_kernel(%arg0: i32, %arg1: i32, %arg2: memref<2x32xf32, #tpu.memory_space<vmem>>, %arg3: memref<1x32xf32, #tpu.memory_space<vmem>>, %arg4: memref<1x2xf32, #tpu.memory_space<vmem>>) attributes {dimension_semantics = [#tpu.dimension_semantics<parallel>, #tpu.dimension_semantics<arbitrary>], iteration_bounds = array<i64: 1, 1>, scalar_prefetch = 0 : i64, scratch_operands = 0 : i64, tpu.core_type = #tpu.core_type<tc>, window_params = [{transform_indices = @transform_0, window_bounds = array<i64: 2, 32>}, {transform_indices = @transform_1, window_bounds = array<i64: 1, 32>}, {transform_indices = @transform_2, window_bounds = array<i64: 1, 2>}]} {
    %c0 = arith.constant 0 : index
    %c0_0 = arith.constant 0 : index
    %0 = vector.load %arg3[%c0, %c0_0] : memref<1x32xf32, #tpu.memory_space<vmem>>, vector<1x32xf32>
    %c0_1 = arith.constant 0 : index
    %c0_2 = arith.constant 0 : index
    %1 = vector.load %arg2[%c0_1, %c0_2] : memref<2x32xf32, #tpu.memory_space<vmem>>, vector<2x32xf32>
    %cst = arith.constant dense<0.000000e+00> : vector<1x2xf32>
    %2 = tpu.matmul %0, %1, %cst {dimension_numbers = #tpu.dot_dimension_numbers<[1], [1], [0], [0], [0, 0, 1, 0], [], []>} : vector<1x32xf32>, vector<2x32xf32>, vector<1x2xf32> -> vector<1x2xf32>
    %c0_i32 = arith.constant 0 : i32
    %3 = arith.cmpi eq, %arg1, %c0_i32 : i32
    %4 = arith.extui %3 : i1 to i32
    %c0_i32_3 = arith.constant 0 : i32
    %5 = arith.cmpi ne, %4, %c0_i32_3 : i32
    scf.if %5 {
      %c0_8 = arith.constant 0 : index
      %c0_9 = arith.constant 0 : index
      %12 = vector.load %arg4[%c0_8, %c0_9] : memref<1x2xf32, #tpu.memory_space<vmem>>, vector<1x2xf32>
      tpu.vector_store %arg4[%c0_8, %c0_9], %2 {strides = array<i32>} : memref<1x2xf32, #tpu.memory_space<vmem>>, vector<1x2xf32>,
    } else {
    }
    %c0_i32_4 = arith.constant 0 : i32
    %6 = arith.cmpi sgt, %arg1, %c0_i32_4 : i32
    %7 = arith.extui %6 : i1 to i32
    %c0_i32_5 = arith.constant 0 : i32
    %8 = arith.cmpi ne, %7, %c0_i32_5 : i32
    scf.if %8 {
      %c0_8 = arith.constant 0 : index
      %c0_9 = arith.constant 0 : index
      %12 = vector.load %arg4[%c0_8, %c0_9] : memref<1x2xf32, #tpu.memory_space<vmem>>, vector<1x2xf32>
      %13 = arith.addf %12, %2 : vector<1x2xf32>
      %c0_10 = arith.constant 0 : index
      %c0_11 = arith.constant 0 : index
      %14 = vector.load %arg4[%c0_10, %c0_11] : memref<1x2xf32, #tpu.memory_space<vmem>>, vector<1x2xf32>
      tpu.vector_store %arg4[%c0_10, %c0_11], %13 {strides = array<i32>} : memref<1x2xf32, #tpu.memory_space<vmem>>, vector<1x2xf32>,
    } else {
    }
    %c0_i32_6 = arith.constant 0 : i32
    %9 = arith.cmpi eq, %arg1, %c0_i32_6 : i32
    %10 = arith.extui %9 : i1 to i32
    %c0_i32_7 = arith.constant 0 : i32
    %11 = arith.cmpi ne, %10, %c0_i32_7 : i32
    scf.if %11 {
      %c0_8 = arith.constant 0 : index
      %c0_9 = arith.constant 0 : index
      %12 = vector.load %arg4[%c0_8, %c0_9] : memref<1x2xf32, #tpu.memory_space<vmem>>, vector<1x2xf32>
      %cst_10 = arith.constant 7.500000e-01 : f32
      %13 = vector.broadcast %cst_10 : f32 to vector<1x2xf32>
      %14 = arith.mulf %12, %13 : vector<1x2xf32>
      %c0_11 = arith.constant 0 : index
      %c0_12 = arith.constant 0 : index
      %15 = vector.load %arg4[%c0_11, %c0_12] : memref<1x2xf32, #tpu.memory_space<vmem>>, vector<1x2xf32>
      tpu.vector_store %arg4[%c0_11, %c0_12], %14 {strides = array<i32>} : memref<1x2xf32, #tpu.memory_space<vmem>>, vector<1x2xf32>,
    } else {
    }
    return
  }
  func.func @transform_0(%arg0: i32, %arg1: i32) -> (i32, i32) {
    %c0_i32 = arith.constant 0 : i32
    return %arg0, %arg1 : i32, i32
  }
  func.func @transform_1(%arg0: i32, %arg1: i32) -> (i32, i32) {
    %c0_i32 = arith.constant 0 : i32
    %c0_i32_0 = arith.constant 0 : i32
    return %c0_i32, %arg1 : i32, i32
  }
  func.func @transform_2(%arg0: i32, %arg1: i32) -> (i32, i32) {
    %c0_i32 = arith.constant 0 : i32
    %c0_i32_0 = arith.constant 0 : i32
    return %c0_i32, %arg0 : i32, i32
  }
}

</mosaic_0001>

<bundles_post_ra>
// kernel: tpu_custom_call.1
= control target key start
LH: loop header
LB: loop body
LE: loop exit
PB: predicated region body
PF: predicated region fallthrough
CT: control target
= control target key end

     0   :  { %7 = vsyncpa [#allocation3], 0  ;;  %s224_s0 = inlined_call_operand.hbm [shape: f32[2,32], index: 0, kind: input, shape index: {}]   ;;  %s225_s1 = inlined_call_operand.vmem [shape: f32[1,32], index: 1, kind: input, shape index: {}]   ;;  %s226_s2 = inlined_call_operand.hbm [shape: f32[1,2], index: 2, kind: output, shape index: {}]  }
   0x1   :  { %8 = vsyncpa [#allocation4], 0  ;;  %s196_s9 = smov [#allocation2]  }
   0x2   :  { %s15_s10 = sshll.u32 %s196_s9, 4  ;;  %s16_s10 = int_to_ptr.vmem [resolvable:$true] %s15_s10 }
   0x3   :  { %s160_s11 = scalar_lea.vmem %s16_s10, 32  ;;  %p165_p1 = scmp.lt.s32.totalorder %s16_s10, %s16_s10 }
   0x4   :  { %p161_p0 = scmp.ne.s32.totalorder %s16_s10, %s160_s11  ;;  %p166_p2 = scmp.lt.s32.totalorder %s160_s11, %s160_s11 }
   0x6   :  { %p167_p3 = por %p166_p2, %p165_p1 }
   0x8   :  { %p168_p4 = pnand %p167_p3, %p161_p0 }
   0xa   :  { %171 = shalt.err (!%p168_p4)
}
   0xb   :  { %18 = dma.hbm_to_vmem [thread:$0]  %s224_s0, 32, %s16_s10, [#allocation3]  }
   0xc   :  { %192 = dma.done.wait [#allocation3], 32  }
   0xd   :  { %193 = vsyncadd [#allocation3], 4294967264  ;;  %v197_v0 = vmov 0.0   ;;  %vm198_vm0 = vmmov 0   ;;  %vm26_vm1 = vcmask 261120   ;;  %vm107_vm2 = vcmask 8192  }
   0xe   :  { %143 = vmatprep.subr.mxu0 %v197_v0  ;;  %145 = vmatprep.mubr.msk.f32.mxu0 %vm198_vm0, %v197_v0  ;;  %v25_v1 = vld [vmem:[#allocation2] sm:$0x3]  ;;  %s199_s16 = smov [#allocation5]  }
   0xf   :  { %144 = vmatpush3.xpose.msk.msra.mxu0 %vm26_vm1, %v25_v1  ;;  %v24_v2 = vld [vmem:[%s225_s1] sm:$0x1]  ;;  %s130_s0 = sshll.u32 %s199_s16, 4  ;;  %s131_s0 = int_to_ptr.vmem [resolvable:$true] %s130_s0 }
  0x10   :  { %s172_s17 = scalar_lea.vmem %s131_s0, 16  ;;  %s176_s18 = scalar_lea.vmem %s131_s0, 32 }
  0x11   :  { %p173_p5 = scmp.ne.s32.totalorder %s131_s0, %s172_s17  ;;  %p177_p6 = scmp.lt.s32.totalorder %s131_s0, %s131_s0 }
  0x12   :  { %146 = vmatmul.mubr.msk.f32.vlgmr.msra.gmra.mxu0 %vm26_vm1, %v24_v2  ;;  %p178_p7 = scmp.lt.s32.totalorder %s176_s18, %s172_s17 }
  0x14   :  { %p179_p8 = por %p178_p7, %p177_p6 }
  0x16   :  { %p180_p9 = pnand %p179_p8, %p173_p5 }
  0xd2   :  { %v99_v3 = vpop.f32.mrf.mxu0 }
  0xd3   :  { %108 = vst.msk [vmem:[#allocation5] sm:$0x1] %vm107_vm2, %v99_v3 }
  0xd4   :  { %v147_v4 = vpop.f32.mrf.mxu0 }
  0xda   :  { %v120_v5 = vld [vmem:[#allocation5] sm:$0x1] }
  0xdb   :  { %v121_v6 = vmul.f32 0.75, %v120_v5 }
  0xdd   :  { %123 = vst.msk [vmem:[#allocation5] sm:$0x1] %vm107_vm2, %v121_v6 }
  0xde   :  { %183 = shalt.err (!%p180_p9)
}
  0xdf   :  { %133 = dma.vmem_to_hbm [thread:$0]  %s131_s0, 16, %s226_s2, [#allocation4]  }
  0xe0   :  { %194 = dma.done.wait [#allocation4], 16  }
  0xe1   :  { %195 = vsyncadd [#allocation4], 4294967280 }
  0xe2   :  { %137 = vsyncpa [#allocation3], 1 }
  0xe3   :  { %138 = vsyncpa [#allocation4], 1 }

</bundles_post_ra>
